<compile_context>
chip_gen: v6e
topology: v6e:2x2x1
jax: 0.10.0
libtpu: 0.0.40
codegen_flags: <defaults>
</compile_context>

<pallas_src>
import jax
import jax.numpy as jnp
from jax import lax
from jax.experimental import pallas as pl
from jax.experimental.pallas import tpu as pltpu


_NUM_CORES = 2  # v7x has 2 TensorCores/chip; on v5e/v6e this axis just runs sequentially.


# ----------------------------- helpers --------------------------------------

def _round_up(a: int, b: int) -> int:
    return ((a + b - 1) // b) * b


def _round_down(a: int, b: int) -> int:
    return (a // b) * b


def _choose_rows(M: int, tm_max: int, bytes_per_row: int,
                 vmem_budget: int = 12 << 20) -> int:
    """Row tile: multiple of 8, <= tm_max, <= round_up(M,8), double-buffered <= budget."""
    cap = _round_down(max(vmem_budget // max(1, 2 * bytes_per_row), 8), 8)
    tm = min(tm_max, _round_up(M, 8), cap)
    return max(8, _round_down(tm, 8))


# ----------------------------- loss kernel -----------------------------------

def _make_loss_kernel(tm: int, D: int, m_valid: int, blocks_per_core: int):
    """Fused logvar = x@W + b; NLL contributions accumulated in per-core VMEM scratch."""
    # Only compile the mask path if some (c, i) block can contain rows >= m_valid
    # (true tail block or phantom blocks created by the per-core split).
    needs_mask = (_NUM_CORES * blocks_per_core * tm) > m_valid

    def kernel(x_ref, pred_ref, tgt_ref, w_ref, b_ref, out_ref, acc_ref):
        c = pl.program_id(0)
        i = pl.program_id(1)

        @pl.when(i == 0)
        def _():
            acc_ref[...] = jnp.zeros_like(acc_ref)

        logvar = (jnp.dot(x_ref[...], w_ref[...],
                          preferred_element_type=jnp.float32)
                  + b_ref[...].astype(jnp.float32))
        diff = (pred_ref[...].astype(jnp.float32)
                - tgt_ref[...].astype(jnp.float32))
        # per-sample: sum_d [ log var_d + (pred - target)_d^2 / var_d ]
        contrib = logvar + diff * diff * jnp.exp(-logvar)

        if needs_mask:
            g = (c * blocks_per_core + i) * tm   # intended global row start

            @pl.when(g + tm <= m_valid)          # full block: no mask cost
            def _():
                acc_ref[...] += contrib

            @pl.when(g + tm > m_valid)           # tail / phantom block: mask garbage rows
            def _():
                row = g + lax.broadcasted_iota(jnp.int32, (tm, D), 0)
                acc_ref[...] += jnp.where(row < m_valid, contrib, 0.0)
        else:
            acc_ref[...] += contrib

        @pl.when(i == blocks_per_core - 1)
        def _():
            # One cross-lane/sublane reduction per core, one block store.
            partial = jnp.sum(acc_ref[...])
            out_ref[...] = jnp.broadcast_to(partial, (1, 8, 128)).astype(jnp.float32)

    return kernel


def _loss_pallas(x2d, pred2d, tgt2d, w, b, *, tm_max=4096):
    M, D = x2d.shape
    itemsize = max(x2d.dtype.itemsize, pred2d.dtype.itemsize, tgt2d.dtype.itemsize)
    tm = _choose_rows(M, tm_max, bytes_per_row=3 * D * itemsize + D * 4)
    nblocks = pl.cdiv(M, tm)
    bpc = pl.cdiv(nblocks, _NUM_CORES)   # blocks per core

    def row_map(c, i):
        # Clamp phantom blocks (when nblocks doesn't split evenly across cores)
        # to the last valid block; their contributions are masked in-kernel.
        return (jnp.minimum(c * bpc + i, nblocks - 1), 0)

    kernel = _make_loss_kernel(tm, D, M, bpc)
    partials = pl.pallas_call(
        kernel,
        out_shape=jax.ShapeDtypeStruct((_NUM_CORES, 8, 128), jnp.float32),
        grid_spec=pltpu.PrefetchScalarGridSpec(
            num_scalar_prefetch=0,
            grid=(_NUM_CORES, bpc),
            in_specs=[
                pl.BlockSpec((tm, D), row_map),
                pl.BlockSpec((tm, D), row_map),
                pl.BlockSpec((tm, D), row_map),
                pl.BlockSpec((D, D), lambda c, i: (0, 0)),   # W resident
                pl.BlockSpec((1, D), lambda c, i: (0, 0)),   # b resident
            ],
            out_specs=pl.BlockSpec((1, 8, 128), lambda c, i: (c, 0, 0)),
            scratch_shapes=[pltpu.VMEM((tm, D), jnp.float32)],
        ),
        compiler_params=pltpu.CompilerParams(
            dimension_semantics=("parallel", "arbitrary")),
    )(x2d, pred2d, tgt2d, w, b)
    # Sum the per-core partials; mean over (bs * nsteps).
    return jnp.sum(partials[:, 0, 0]) / M


# ----------------------------- cov / chol kernels -----------------------------

def _make_cov_kernel(scale: float, dense: bool):
    """Fused logvar = x@W + b; exp(scale*logvar); optional MXU one-hot diag scatter.

    e_ref is (D, D*D) one-hot with E[i, i*(D+1)] == 1, so diag_vals @ E places each
    diagonal value exactly (multipliers are 1/0) into the flattened row-major D*D
    layout; the (tm, D*D) output block is lane-dense (unmasked full-width stores).
    Garbage tail rows may produce inf/NaN in-flight; their writeback is dropped.
    """
    def kernel(x_ref, w_ref, b_ref, *rest):
        if dense:
            e_ref, out_ref = rest
        else:
            (out_ref,) = rest
        logvar = (jnp.dot(x_ref[...], w_ref[...],
                          preferred_element_type=jnp.float32)
                  + b_ref[...].astype(jnp.float32))
        diag_vals = jnp.exp(scale * logvar)          # single exp per element
        if dense:
            out_ref[...] = jnp.dot(diag_vals, e_ref[...],
                                   preferred_element_type=jnp.float32)
        else:
            out_ref[...] = diag_vals

    return kernel


def _cov_pallas(x2d, w, b, e_scatter, *, half: bool, dense: bool, tm_max=1024):
    M, D = x2d.shape
    out_cols = D * D if dense else D
    tm = _choose_rows(M, tm_max,
                      bytes_per_row=out_cols * 4 + D * x2d.dtype.itemsize)
    nblocks = pl.cdiv(M, tm)

    in_specs = [
        pl.BlockSpec((tm, D), lambda i: (i, 0)),
        pl.BlockSpec((D, D), lambda i: (0, 0)),        # W resident
        pl.BlockSpec((1, D), lambda i: (0, 0)),        # b resident
    ]
    args = [x2d, w, b]
    if dense:
        in_specs.append(pl.BlockSpec((D, D * D), lambda i: (0, 0)))  # one-hot scatter
        args.append(e_scatter)

    kernel = _make_cov_kernel(0.5 if half else 1.0, dense)
    return pl.pallas_call(
        kernel,
        out_shape=jax.ShapeDtypeStruct((M, out_cols), jnp.float32),
        grid_spec=pltpu.PrefetchScalarGridSpec(
            num_scalar_prefetch=0,
            grid=(nblocks,),
            in_specs=in_specs,
            out_specs=pl.BlockSpec((tm, out_cols), lambda i: (i, 0)),
        ),
        compiler_params=pltpu.CompilerParams(
            dimension_semantics=("parallel",)),
    )(*args)


# ----------------------------- module ----------------------------------------

class Uncertainty:
    """Diagonal-Gaussian uncertainty head (concrete Pallas instantiation)."""
    name = 'Uncertainty_diag_gaussian_pallas'

    def __init__(self, ndim: int, loss_tile: int = 4096, cov_tile: int = 1024):
        self.ndim = ndim
        self.loss_tile = loss_tile
        self.cov_tile = cov_tile
        # Deterministic parameter init (synthetic; no checkpoint load).
        kw, _ = jax.random.split(jax.random.PRNGKey(42))
        self.w = (jax.random.normal(kw, (ndim, ndim), jnp.float32)
                  * (0.1 / jnp.sqrt(ndim)))
        self.b = jnp.zeros((1, ndim), jnp.float32)
        # (D, D*D) one-hot scatter matrix: row i has a single 1.0 at column i*D + i.
        d = ndim
        self._e_scatter = jnp.zeros((d, d * d), jnp.float32).at[
            jnp.arange(d), jnp.arange(d) * (d + 1)].set(1.0)

    def _flatten(self, x):
        bs, nsteps, d = x.shape
        assert d == self.ndim
        # Keep native dtype (e.g. bf16); cast to f32 happens inside the kernels.
        return x.reshape(bs * nsteps, d), (bs, nsteps)

    def get_cov(self, x):
        x2d, (bs, ns) = self._flatten(x)
        flat = _cov_pallas(x2d, self.w, self.b, self._e_scatter,
                           half=False, dense=True, tm_max=self.cov_tile)
        return flat.reshape(bs, ns, self.ndim, self.ndim)

    def get_cov_chol_mat(self, x):
        x2d, (bs, ns) = self._flatten(x)
        flat = _cov_pallas(x2d, self.w, self.b, self._e_scatter,
                           half=True, dense=True, tm_max=self.cov_tile)
        return flat.reshape(bs, ns, self.ndim, self.ndim)

    def get_cov_diag(self, x):
        """Diagonal-only covariance (bs, nsteps, D): ~D x less HBM write traffic."""
        x2d, (bs, ns) = self._flatten(x)
        flat = _cov_pallas(x2d, self.w, self.b, None,
                           half=False, dense=False, tm_max=self.cov_tile)
        return flat.reshape(bs, ns, self.ndim)

    def likelihood_loss(self, x, x_pred=None, x_target=None):
        x2d, _ = self._flatten(x)
        p2d, _ = self._flatten(x_pred)
        t2d, _ = self._flatten(x_target)
        return _loss_pallas(x2d, p2d, t2d, self.w, self.b, tm_max=self.loss_tile)

    def forward(self, x, x_pred=None, x_target=None, output='loss'):
        if output == 'loss':
            return self.likelihood_loss(x, x_pred, x_target)
        elif output == 'cov':
            return self.get_cov(x)
        elif output == 'cov_chol_mat':
            return self.get_cov_chol_mat(x)

    __call__ = forward

    @property
    def model_state(self):
        return {'name': self.name}

    def init_before_train(self, *args, **kwargs):
        pass

    # TODO(synk): using_parallel() (torch DataParallel toggle) and logger plumbing have
    # no kernel-level meaning on TPU; intentionally not implemented.


# ----------------------------- demo / check ----------------------------------

def _reference(model, x, x_pred, x_target):
    bs, ns, d = x.shape
    x2d = x.reshape(-1, d).astype(jnp.float32)
    logvar = x2d @ model.w + model.b
    diff = (x_pred - x_target).reshape(-1, d).astype(jnp.float32)
    ref_loss = jnp.mean(jnp.sum(logvar + diff * diff * jnp.exp(-logvar), axis=-1))
    ref_cov = jax.vmap(jnp.diag)(jnp.exp(logvar)).reshape(bs, ns, d, d)
    ref_chol = jax.vmap(jnp.diag)(jnp.exp(0.5 * logvar)).reshape(bs, ns, d, d)
    ref_diag = jnp.exp(logvar).reshape(bs, ns, d)
    return ref_loss, ref_cov, ref_chol, ref_diag


if __name__ == "__main__":
    latent_dim = 32
    model = Uncertainty(ndim=latent_dim)

    # Second shape exercises the non-divisible tail / phantom-block path (M = 15 rows).
    for (bs, nsteps) in [(2, 8), (3, 5)]:
        key = jax.random.PRNGKey(0)
        k1, k2, k3 = jax.random.split(key, 3)
        x = jax.random.normal(k1, (bs, nsteps, latent_dim), jnp.float32)
        x_pred = jax.random.normal(k2, (bs, nsteps, latent_dim), jnp.float32)
        x_target = jax.random.normal(k3, (bs, nsteps, latent_dim), jnp.float32)

        loss = model(x, x_pred, x_target, output='loss')
        cov = model(x, output='cov')
        chol = model(x, output='cov_chol_mat')
        diag = model.get_cov_diag(x)
        jax.block_until_ready((loss, cov, chol, diag))

        ref_loss, ref_cov, ref_chol, ref_diag = _reference(model, x, x_pred, x_target)

        assert cov.shape == (bs, nsteps, latent_dim, latent_dim)
        assert chol.shape == (bs, nsteps, latent_dim, latent_dim)
        assert diag.shape == (bs, nsteps, latent_dim)
        assert jnp.allclose(loss, ref_loss, rtol=1e-5, atol=1e-5), (loss, ref_loss)
        assert jnp.allclose(cov, ref_cov, rtol=1e-5, atol=1e-5)
        assert jnp.allclose(chol, ref_chol, rtol=1e-5, atol=1e-5)
        assert jnp.allclose(diag, ref_diag, rtol=1e-5, atol=1e-5)

    print("KERNEL_OK")
</pallas_src>

<mosaic_0001>
module attributes {stable_mosaic.version = 11 : i64} {
  func.func @kernel(%arg0: i32, %arg1: i32, %arg2: memref<16x32xf32, #tpu.memory_space<vmem>>, %arg3: memref<16x32xf32, #tpu.memory_space<vmem>>, %arg4: memref<16x32xf32, #tpu.memory_space<vmem>>, %arg5: memref<32x32xf32, #tpu.memory_space<vmem>>, %arg6: memref<1x32xf32, #tpu.memory_space<vmem>>, %arg7: memref<1x8x128xf32, #tpu.memory_space<vmem>>, %arg8: memref<16x32xf32, #tpu.memory_space<vmem>>) attributes {dimension_semantics = [#tpu.dimension_semantics<parallel>, #tpu.dimension_semantics<arbitrary>], iteration_bounds = array<i64: 2, 1>, scalar_prefetch = 0 : i64, scratch_operands = 1 : i64, tpu.core_type = #tpu.core_type<tc>, window_params = [{transform_indices = @transform_0, window_bounds = array<i64: 16, 32>}, {transform_indices = @transform_1, window_bounds = array<i64: 16, 32>}, {transform_indices = @transform_2, window_bounds = array<i64: 16, 32>}, {pipeline_mode = #tpu.pipeline_mode<synchronous>, transform_indices = @transform_3, window_bounds = array<i64: 32, 32>}, {pipeline_mode = #tpu.pipeline_mode<synchronous>, transform_indices = @transform_4, window_bounds = array<i64: 1, 32>}, {transform_indices = @transform_5, window_bounds = array<i64: 1, 8, 128>}]} {
    %c0_i32 = arith.constant 0 : i32
    %0 = arith.cmpi eq, %arg1, %c0_i32 : i32
    %1 = arith.extui %0 : i1 to i32
    %c0_i32_0 = arith.constant 0 : i32
    %2 = arith.cmpi ne, %1, %c0_i32_0 : i32
    scf.if %2 {
      %cst_19 = arith.constant 0.000000e+00 : f32
      %32 = vector.broadcast %cst_19 : f32 to vector<16x32xf32>
      %c0_20 = arith.constant 0 : index
      %c0_21 = arith.constant 0 : index
      %33 = vector.load %arg8[%c0_20, %c0_21] : memref<16x32xf32, #tpu.memory_space<vmem>>, vector<16x32xf32>
      tpu.vector_store %arg8[%c0_20, %c0_21], %32 {strides = array<i32>} : memref<16x32xf32, #tpu.memory_space<vmem>>, vector<16x32xf32>,
    } else {
    }
    %c0 = arith.constant 0 : index
    %c0_1 = arith.constant 0 : index
    %3 = vector.load %arg2[%c0, %c0_1] : memref<16x32xf32, #tpu.memory_space<vmem>>, vector<16x32xf32>
    %c0_2 = arith.constant 0 : index
    %c0_3 = arith.constant 0 : index
    %4 = vector.load %arg5[%c0_2, %c0_3] : memref<32x32xf32, #tpu.memory_space<vmem>>, vector<32x32xf32>
    %cst = arith.constant dense<0.000000e+00> : vector<16x32xf32>
    %5 = tpu.matmul %3, %4, %cst {dimension_numbers = #tpu.dot_dimension_numbers<[1], [0], [0], [1], [0, 0, 1, 1], [], []>} : vector<16x32xf32>, vector<32x32xf32>, vector<16x32xf32> -> vector<16x32xf32>
    %c0_4 = arith.constant 0 : index
    %c0_5 = arith.constant 0 : index
    %6 = vector.load %arg6[%c0_4, %c0_5] : memref<1x32xf32, #tpu.memory_space<vmem>>, vector<1x32xf32>
    %7 = vector.broadcast %6 : vector<1x32xf32> to vector<16x32xf32>
    %8 = arith.addf %5, %7 : vector<16x32xf32>
    %c0_6 = arith.constant 0 : index
    %c0_7 = arith.constant 0 : index
    %9 = vector.load %arg3[%c0_6, %c0_7] : memref<16x32xf32, #tpu.memory_space<vmem>>, vector<16x32xf32>
    %c0_8 = arith.constant 0 : index
    %c0_9 = arith.constant 0 : index
    %10 = vector.load %arg4[%c0_8, %c0_9] : memref<16x32xf32, #tpu.memory_space<vmem>>, vector<16x32xf32>
    %11 = arith.subf %9, %10 : vector<16x32xf32>
    %12 = arith.mulf %11, %11 : vector<16x32xf32>
    %cst_10 = arith.constant 0.000000e+00 : f32
    %13 = vector.broadcast %cst_10 : f32 to vector<16x32xf32>
    %14 = arith.subf %13, %8 : vector<16x32xf32>
    %15 = math.exp %14 : vector<16x32xf32>
    %16 = arith.mulf %12, %15 : vector<16x32xf32>
    %17 = arith.addf %8, %16 : vector<16x32xf32>
    %c1_i32 = arith.constant 1 : i32
    %18 = arith.muli %arg0, %c1_i32 : i32
    %19 = arith.addi %18, %arg1 : i32
    %c16_i32 = arith.constant 16 : i32
    %20 = arith.muli %19, %c16_i32 : i32
    %c16_i32_11 = arith.constant 16 : i32
    %21 = arith.addi %20, %c16_i32_11 : i32
    %c16_i32_12 = arith.constant 16 : i32
    %22 = arith.cmpi sle, %21, %c16_i32_12 : i32
    %23 = arith.extui %22 : i1 to i32
    %c0_i32_13 = arith.constant 0 : i32
    %24 = arith.cmpi ne, %23, %c0_i32_13 : i32
    scf.if %24 {
      %c0_19 = arith.constant 0 : index
      %c0_20 = arith.constant 0 : index
      %32 = vector.load %arg8[%c0_19, %c0_20] : memref<16x32xf32, #tpu.memory_space<vmem>>, vector<16x32xf32>
      %33 = arith.addf %32, %17 : vector<16x32xf32>
      %c0_21 = arith.constant 0 : index
      %c0_22 = arith.constant 0 : index
      %34 = vector.load %arg8[%c0_21, %c0_22] : memref<16x32xf32, #tpu.memory_space<vmem>>, vector<16x32xf32>
      tpu.vector_store %arg8[%c0_21, %c0_22], %33 {strides = array<i32>} : memref<16x32xf32, #tpu.memory_space<vmem>>, vector<16x32xf32>,
    } else {
    }
    %c16_i32_14 = arith.constant 16 : i32
    %25 = arith.addi %20, %c16_i32_14 : i32
    %c16_i32_15 = arith.constant 16 : i32
    %26 = arith.cmpi sgt, %25, %c16_i32_15 : i32
    %27 = arith.extui %26 : i1 to i32
    %c0_i32_16 = arith.constant 0 : i32
    %28 = arith.cmpi ne, %27, %c0_i32_16 : i32
    scf.if %28 {
      %32 = tpu.iota {dimensions = array<i32: 0>} : vector<16x32xi32>
      %33 = vector.broadcast %20 : i32 to vector<16x32xi32>
      %34 = arith.addi %33, %32 : vector<16x32xi32>
      %c0_19 = arith.constant 0 : index
      %c0_20 = arith.constant 0 : index
      %35 = vector.load %arg8[%c0_19, %c0_20] : memref<16x32xf32, #tpu.memory_space<vmem>>, vector<16x32xf32>
      %c16_i32_21 = arith.constant 16 : i32
      %36 = vector.broadcast %c16_i32_21 : i32 to vector<16x32xi32>
      %37 = arith.cmpi slt, %34, %36 : vector<16x32xi32>
      %cst_22 = arith.constant 0.000000e+00 : f32
      %38 = vector.broadcast %cst_22 : f32 to vector<16x32xf32>
      %39 = arith.select %37, %17, %38 : vector<16x32xi1>, vector<16x32xf32>
      %40 = arith.addf %35, %39 : vector<16x32xf32>
      %c0_23 = arith.constant 0 : index
      %c0_24 = arith.constant 0 : index
      %41 = vector.load %arg8[%c0_23, %c0_24] : memref<16x32xf32, #tpu.memory_space<vmem>>, vector<16x32xf32>
      tpu.vector_store %arg8[%c0_23, %c0_24], %40 {strides = array<i32>} : memref<16x32xf32, #tpu.memory_space<vmem>>, vector<16x32xf32>,
    } else {
    }
    %c0_i32_17 = arith.constant 0 : i32
    %29 = arith.cmpi eq, %arg1, %c0_i32_17 : i32
    %30 = arith.extui %29 : i1 to i32
    %c0_i32_18 = arith.constant 0 : i32
    %31 = arith.cmpi ne, %30, %c0_i32_18 : i32
    scf.if %31 {
      %c0_19 = arith.constant 0 : index
      %c0_20 = arith.constant 0 : index
      %32 = vector.load %arg8[%c0_19, %c0_20] : memref<16x32xf32, #tpu.memory_space<vmem>>, vector<16x32xf32>
      %33 = vector.shape_cast %32 : vector<16x32xf32> to vector<1x16x32xf32>
      %cst_21 = arith.constant dense<0.000000e+00> : vector<1xf32>
      %34 = vector.multi_reduction <add>, %33, %cst_21 [1, 2] : vector<1x16x32xf32> to vector<1xf32>
      %35 = vector.shape_cast %34 : vector<1xf32> to vector<1x1x1xf32>
      %36 = vector.extract %35[0, 0, 0] : f32 from vector<1x1x1xf32>
      %37 = vector.broadcast %36 : f32 to vector<1x8x128xf32>
      %c0_22 = arith.constant 0 : index
      %c0_23 = arith.constant 0 : index
      %c0_24 = arith.constant 0 : index
      %38 = vector.load %arg7[%c0_22, %c0_23, %c0_24] : memref<1x8x128xf32, #tpu.memory_space<vmem>>, vector<1x8x128xf32>
      tpu.vector_store %arg7[%c0_22, %c0_23, %c0_24], %37 {strides = array<i32>} : memref<1x8x128xf32, #tpu.memory_space<vmem>>, vector<1x8x128xf32>,
    } else {
    }
    return
  }
  func.func @transform_0(%arg0: i32, %arg1: i32) -> (i32, i32) {
    %c1_i32 = arith.constant 1 : i32
    %0 = arith.muli %arg0, %c1_i32 : i32
    %1 = arith.addi %0, %arg1 : i32
    %c0_i32 = arith.constant 0 : i32
    %2 = arith.minsi %1, %c0_i32 : i32
    %c0_i32_0 = arith.constant 0 : i32
    %c0_i32_1 = arith.constant 0 : i32
    return %2, %c0_i32_0 : i32, i32
  }
  func.func @transform_1(%arg0: i32, %arg1: i32) -> (i32, i32) {
    %c1_i32 = arith.constant 1 : i32
    %0 = arith.muli %arg0, %c1_i32 : i32
    %1 = arith.addi %0, %arg1 : i32
    %c0_i32 = arith.constant 0 : i32
    %2 = arith.minsi %1, %c0_i32 : i32
    %c0_i32_0 = arith.constant 0 : i32
    %c0_i32_1 = arith.constant 0 : i32
    return %2, %c0_i32_0 : i32, i32
  }
  func.func @transform_2(%arg0: i32, %arg1: i32) -> (i32, i32) {
    %c1_i32 = arith.constant 1 : i32
    %0 = arith.muli %arg0, %c1_i32 : i32
    %1 = arith.addi %0, %arg1 : i32
    %c0_i32 = arith.constant 0 : i32
    %2 = arith.minsi %1, %c0_i32 : i32
    %c0_i32_0 = arith.constant 0 : i32
    %c0_i32_1 = arith.constant 0 : i32
    return %2, %c0_i32_0 : i32, i32
  }
  func.func @transform_3(%arg0: i32, %arg1: i32) -> (i32, i32) {
    %c0_i32 = arith.constant 0 : i32
    %c0_i32_0 = arith.constant 0 : i32
    %c0_i32_1 = arith.constant 0 : i32
    return %c0_i32, %c0_i32_0 : i32, i32
  }
  func.func @transform_4(%arg0: i32, %arg1: i32) -> (i32, i32) {
    %c0_i32 = arith.constant 0 : i32
    %c0_i32_0 = arith.constant 0 : i32
    %c0_i32_1 = arith.constant 0 : i32
    return %c0_i32, %c0_i32_0 : i32, i32
  }
  func.func @transform_5(%arg0: i32, %arg1: i32) -> (i32, i32, i32) {
    %c0_i32 = arith.constant 0 : i32
    %c0_i32_0 = arith.constant 0 : i32
    %c0_i32_1 = arith.constant 0 : i32
    return %arg0, %c0_i32, %c0_i32_0 : i32, i32, i32
  }
}

</mosaic_0001>

<bundles_post_ra>
// kernel: tpu_custom_call.1
= control target key start
LH: loop header
LB: loop body
LE: loop exit
PB: predicated region body
PF: predicated region fallthrough
CT: control target
= control target key end

     0   :  { %s1427_s0 = inlined_call_operand.hbm [shape: f32[16,32], index: 0, kind: input, shape index: {}]   ;;  %s1428_s1 = inlined_call_operand.hbm [shape: f32[16,32], index: 1, kind: input, shape index: {}]   ;;  %s1429_s2 = inlined_call_operand.hbm [shape: f32[16,32], index: 2, kind: input, shape index: {}]   ;;  %s1430_s3 = inlined_call_operand.hbm [shape: f32[32,32], index: 3, kind: input, shape index: {}]   ;;  %s1431_s4 = inlined_call_operand.vmem [shape: f32[1,32], index: 4, kind: input, shape index: {}]   ;;  %s1432_s5 = inlined_call_operand.hbm [shape: f32[2,8,128], index: 5, kind: output, shape index: {}]  }
   0x1   :  { %1440 = sst [smem:[#allocation20_spill]] %s1428_s1 }
   0x2   :  { %10 = vsyncpa [#allocation4], 0 }
   0x3   :  { %12 = vsyncpa [#allocation4 + $0x1], 0 }
   0x4   :  { %13 = vsyncpa [#allocation7], 0 }
   0x5   :  { %15 = vsyncpa [#allocation7 + $0x1], 0 }
   0x6   :  { %16 = vsyncpa [#allocation10], 0 }
   0x7   :  { %17 = vsyncpa [#allocation5], 0 }
   0x8   :  { %19 = vsyncpa [#allocation5 + $0x1], 0  ;;  %s1128_s18 = smov 0   ;;  %s1130_s19 = smov 0  }
   0x9   :  { %s1132_s20 = smov 0   ;;  %s1134_s21 = smov 0  }
   0xa   :  { %s1136_s22 = smov 0   ;;  %s1138_s23 = smov 0  }
   0xb   :  { %s1140_s24 = smov 0   ;;  %s1142_s25 = smov 0  }
   0xc LB: > { %1441 = sst [smem:[#allocation16_spill]] %s1068_s20  ;;  %s37_s26 = sadd.s32 1, %s1084_s24  ;;  %s1088_s25 = sphi %s1142_s25, %s25_s25   ;;  %s1084_s24 = sphi %s1140_s24, %s1465_s24   ;;  %s1080_s23 = sphi %s1138_s23, %s1464_s23   ;;  %s1076_s22 = sphi %s1136_s22, %s1417_s22   ;;  %s1072_s21 = sphi %s1134_s21, %s1468_s21   ;;  %s1068_s20 = sphi %s1132_s20, %s1463_s20   ;;  %s1064_s19 = sphi %s1130_s19, %s1467_s19   ;;  %s1060_s18 = sphi %s1128_s18, %s1466_s18  }
   0xd   : > { %1442 = sst [smem:[#allocation17_spill]] %s1084_s24  ;;  %p39_p0 = scmp.ge.s32.totalorder %s37_s26, 2 }
   0xe   : > { %p1057_p1 = scmp.ne.s32.totalorder %s1076_s22, 0  ;;  %p58_p2 = scmp.eq.s32.totalorder %s1088_s25, 0 }
   0xf   : > { %s1470_s26 = smov (%p39_p0, %s37_s26), 0  ;;  %p786_p6 = scmp.lt.s32.totalorder %s1088_s25, 2 }
  0x10   : > { %1443 = sst [smem:[#allocation18_spill]] %s1470_s26  ;;  %s179_s27 = ssub.s32 %s1084_s24, %s1470_s26 }
  0x11   : > { %p59_p3 = por %p1057_p1, %p58_p2  ;;  %p1175_p4 = scmp.eq.s32.totalorder %s179_s27, 0 }
  0x12   : > { %s259_s30 = sand.u32 1, %s1088_s25   ;;  %s1090_s6 = smov [#allocation6]  }
  0x13   : > { %s1444_s28 = scalar_select %p1175_p4, 1, 0 }
  0x14   : > { %p1181_p7 = pnand %p786_p6, %p59_p3  ;;  %s273_s7 = sshll.u32 %s1090_s6, 4  ;;  %s274_s7 = int_to_ptr.vmem [resolvable:$true] %s273_s7 }
  0x15   : > { %s1186_s8 = scalar_lea.sflag [#allocation7], %s259_s30  ;;  %s1446_s1 = sld [smem:[#allocation20_spill]] }
  0x16   : > { %p1196_p9 = pneg %p1181_p7 }
  0x1b   : > { %s869_s11 = scalar_lea.hbm %s1446_s1, 256 }
  0x1c   : > { %p870_p8 = scmp.ne.s32.totalorder %s1446_s1, %s869_s11  ;;  %p876_p12 = scmp.lt.s32.totalorder %s869_s11, %s869_s11 }
  0x1e   : > { %p872_p10 = pnand %p1196_p9, %p870_p8 }
  0x20   : > { %p873_p11 = pneg %p872_p10 }
  0x22   : > { %p878_p13 = pnand %p876_p12, %p873_p11 }
  0x24   : > { %881 = shalt.err (!%p878_p13)
}
  0x25   : > { %s882_s15 = scalar_lea.vmem %s274_s7, 256  ;;  %s889_s16 = scalar_lea.vmem %s274_s7, 512 }
  0x26   : > { %p883_p0 = scmp.ne.s32.totalorder %s274_s7, %s882_s15  ;;  %p890_p3 = scmp.lt.s32.totalorder %s274_s7, %s274_s7 }
  0x27   : > { %p891_p6 = scmp.lt.s32.totalorder %s889_s16, %s882_s15 }
  0x28   : > { %p885_p1 = pnand %p883_p0, %p1196_p9 }
  0x29   : > { %p892_p5 = por %p891_p6, %p890_p3 }
  0x2a   : > { %p886_p2 = pneg %p885_p1 }
  0x2c   : > { %p893_p4 = pnand %p892_p5, %p886_p2 }
  0x2e   : > { %896 = shalt.err (!%p893_p4)
}
  0x2f   : > { %s1091_s17 = smov 128   ;;  %s1092_s27 = smov 8  }
  0x30   : > { %777 = dma.hbm_to_vmem [thread:$0]  (!%p1181_p7), %s1446_s1, 256, %s274_s7, %s1186_s8, %s1091_s17, %s1091_s17, %s1092_s27  }
  0x31   : > { %s1214_s9 = sadd.s32 4294967295, %s1088_s25   ;;  %s704_s10 = sadd.s32 4294967294, %s1088_s25  }
  0x32   : > { %p63_p4 = scmp.ne.s32.totalorder %s1076_s22, %s1072_s21  ;;  %p1438_p5 = scmp.eq.s32.totalorder %s1214_s9, 0 }
  0x33   : > { %s182_s11 = sadd.s32 1, %s1068_s20  ;;  %p1448_p8 = scmp.ne.s32.totalorder %s1444_s28, 0 }
  0x34   : > { %p1228_p10 = por %p1438_p5, %p63_p4  ;;  %p192_p11 = scmp.ne.s32.totalorder %s1068_s20, %s1064_s19 }
  0x35   : > { %s1224_s12 = scalar_select %p1448_p8, %s1068_s20, %s182_s11  }
  0x36   : > { %s1450_s13 = scalar_select %p1228_p10, 1, 0 }
  0x37   : > { %1449 = sst [smem:[#allocation19_spill]] %s1224_s12  ;;  %p193_p12 = scmp.eq.s32.totalorder %s1214_s9, 1 }
  0x38   : > { %p198_p13 = scmp.ne.s32.totalorder %s1064_s19, %s1060_s18  ;;  %p199_p0 = scmp.eq.s32.totalorder %s704_s10, 1 }
  0x39   : > { %p705_p1 = scmp.ge.s32.totalorder %s1088_s25, 1  ;;  %p1238_p2 = por %p193_p12, %p192_p11 }
  0x3a   : > { %p206_p3 = scmp.lt.s32.totalorder %s1088_s25, 3  ;;  %p1243_p6 = por %p199_p0, %p198_p13 }
  0x3b   : > { %s1451_s7 = scalar_select %p1238_p2, 1, 0 }
  0x3c   : > { %s1452_s21 = scalar_select %p1243_p6, 1, 0 }
  0x3d   : > { %p1247_p8 = pnand %p705_p1, %p206_p3  ;;  %s1093_s15 = smov [#allocation9]  }
  0x3e   : > { %s218_s16 = sshll.u32 %s1093_s15, 4  ;;  %s1094_s6 = smov [#allocation3]   ;;  %s219_s16 = int_to_ptr.vmem [resolvable:$true] %s218_s16 }
  0x3f   : > { %s1453_s28 = scalar_select %p1247_p8, 1, 0 }
  0x40   : > { %p767_p4 = pneg %p1247_p8  ;;  %s249_s10 = sshll.u32 %s1094_s6, 4  ;;  %s1259_s10 = int_to_ptr.vmem [resolvable:$true] %s249_s10 }
  0x41   : > { %s908_s11 = scalar_lea.vmem %s219_s16, 512  ;;  %p916_p3 = scmp.lt.s32.totalorder %s219_s16, %s219_s16 }
  0x42   : > { %p1255_p11 = pnand %p767_p4, %p1438_p5  ;;  %p909_p13 = scmp.ne.s32.totalorder %s219_s16, %s908_s11 }
  0x43   : > { %p917_p6 = scmp.lt.s32.totalorder %s908_s11, %s908_s11 }
  0x44   : > { %p899_p12 = pneg %p1255_p11 }
  0x45   : > { %p918_p2 = por %p917_p6, %p916_p3 }
  0x46   : > { %p911_p0 = pnand %p909_p13, %p899_p12 }
  0x48   : > { %p912_p1 = pneg %p911_p0 }
  0x4a   : > { %p919_p10 = pnand %p918_p2, %p912_p1 }
  0x4c   : > { %922 = shalt.err (!%p919_p10)
}
  0x4d   : > { %770 = dma.hbm_to_vmem [thread:$0]  (!%p1255_p11), %s1430_s3, 512, %s219_s16, [#allocation10], %s1091_s17, %s1091_s17, %s1092_s27  }
  0x4e   : > { %s923_s24 = scalar_lea.hbm %s1427_s0, 256 }
  0x4f   : > { %p924_p6 = scmp.ne.s32.totalorder %s1427_s0, %s923_s24  ;;  %p930_p4 = scmp.lt.s32.totalorder %s923_s24, %s923_s24 }
  0x51   : > { %p926_p10 = pnand %p924_p6, %p1196_p9 }
  0x53   : > { %p927_p2 = pneg %p926_p10 }
  0x55   : > { %p932_p12 = pnand %p930_p4, %p927_p2 }
  0x57   : > { %935 = shalt.err (!%p932_p12)
}
  0x58   : > { %s936_s16 = scalar_lea.vmem %s1259_s10, 256  ;;  %s943_s1 = scalar_lea.vmem %s1259_s10, 512 }
  0x59   : > { %p937_p11 = scmp.ne.s32.totalorder %s1259_s10, %s936_s16  ;;  %p944_p1 = scmp.lt.s32.totalorder %s1259_s10, %s1259_s10 }
  0x5a   : > { %p945_p3 = scmp.lt.s32.totalorder %s943_s1, %s936_s16 }
  0x5b   : > { %p939_p13 = pnand %p937_p11, %p1196_p9 }
  0x5c   : > { %p946_p5 = por %p945_p3, %p944_p1 }
  0x5d   : > { %p940_p0 = pneg %p939_p13 }
  0x5f   : > { %p947_p6 = pnand %p946_p5, %p940_p0 }
  0x61   : > { %950 = shalt.err (!%p947_p6)
}
  0x62   : > { %774 = dma.hbm_to_vmem [thread:$0]  (!%p1181_p7), %s1427_s0, 256, %s1259_s10, [#allocation4], %s1091_s17, %s1091_s17, %s1092_s27  }
  0x63   : > { %s1095_s26 = smov [#allocation8]   ;;  %s951_s15 = scalar_lea.hbm %s1429_s2, 256 }
  0x64   : > { %s297_s12 = sshll.u32 %s1095_s26, 4  ;;  %p952_p5 = scmp.ne.s32.totalorder %s1429_s2, %s951_s15  ;;  %s298_s12 = int_to_ptr.vmem [resolvable:$true] %s297_s12 }
  0x65   : > { %p958_p4 = scmp.lt.s32.totalorder %s951_s15, %s951_s15 }
  0x66   : > { %p954_p10 = pnand %p952_p5, %p1196_p9 }
  0x68   : > { %p955_p2 = pneg %p954_p10 }
  0x6a   : > { %p960_p12 = pnand %p958_p4, %p955_p2 }
  0x6c   : > { %963 = shalt.err (!%p960_p12)
}
  0x6d   : > { %s964_s1 = scalar_lea.vmem %s298_s12, 256  ;;  %s971_s10 = scalar_lea.vmem %s298_s12, 512 }
  0x6e   : > { %p965_p11 = scmp.ne.s32.totalorder %s298_s12, %s964_s1  ;;  %p972_p1 = scmp.lt.s32.totalorder %s298_s12, %s298_s12 }
  0x6f   : > { %p973_p3 = scmp.lt.s32.totalorder %s971_s10, %s964_s1 }
  0x70   : > { %p967_p13 = pnand %p965_p11, %p1196_p9 }
  0x71   : > { %p974_p6 = por %p973_p3, %p972_p1 }
  0x72   : > { %p968_p0 = pneg %p967_p13 }
  0x74   : > { %p975_p8 = pnand %p974_p6, %p968_p0 }
  0x76   : > { %978 = shalt.err (!%p975_p8)
}
  0x77   : > { %780 = dma.hbm_to_vmem [thread:$0]  (!%p1181_p7), %s1429_s2, 256, %s298_s12, %s1186_s8, %s1091_s17, %s1091_s17, %s1092_s27  }
  0x78   : > { %p1455_p5 = scmp.ne.s32.totalorder %s1453_s28, 0 }
  0x79   : > { %s311_s14 = sand.u32 (!%p1455_p5), 1, %s1076_s22   ;;  %p1456_p9 = scmp.ne.s32.totalorder (!%p1455_p5), %s1450_s13, 0 }
  0x7a   : > { %309 = sbr.rel (%p1455_p5) target bundleno = 609 (0x261), region = 40  ;;  %s1317_s26 = sshll.u32 (!%p1455_p5), %s311_s14, 4 }
  0x7b   : > { %s312_s30 = scalar_lea.sflag (!%p1455_p5), [#allocation4], %s311_s14  ;;  %s315_s11 = scalar_lea.vmem (!%p1455_p5), [#allocation3], %s1317_s26 }
  0x7f   : > { %1042 = dma.done.wait (%p1456_p9), %s312_s30, 256  }
  0x80   : > { %1044 = vsyncadd (%p1456_p9), %s312_s30, 4294967040  ;;  %s320_s29 = sand.u32 1, %s1214_s9   ;;  %s324_s17 = scalar_lea.vmem [#allocation6], %s1317_s26 }
  0x81   : > { %s321_s8 = scalar_lea.sflag [#allocation7], %s320_s29 }
  0x82   : > { %1046 = dma.done.wait (%p1456_p9), %s321_s8, 512  }
  0x83   : > { %1048 = vsyncadd (%p1456_p9), %s321_s8, 4294966784  ;;  %s333_s27 = scalar_lea.vmem [#allocation8], %s1317_s26  ;;  %p1457_p7 = scmp.eq.s32.totalorder %s1214_s9, 0 }
  0x85   : > { %1050 = dma.done.wait (%p1457_p7), [#allocation10], 512   ;;  %p1458_p8 = pmov %p1457_p7 }
  0x86   : > { %s371_s28 = sand.u32 1, %s1064_s19   ;;  %vm390_vm0 = vcmask 261120   ;;  %v1096_v0 = vmov 0.0   ;;  %v398_v1 = vld [vmem:[#allocation9 + $0x18] sm:$0xff]  ;;  %v397_v2 = vld [vmem:[#allocation9 + $0x10] sm:$0xff]  ;;  %v396_v4 = vld [vmem:[#allocation9 + $0x8] sm:$0xff] }
  0x87   : > { %1052 = vsyncadd (%p1458_p8), [#allocation10], 4294966784  ;;  %s1338_s12 = sshll.u32 %s371_s28, 3  ;;  %391 = vst.msk [vmem:[#allocation2] sm:$0xff] %vm390_vm0, %v1096_v0  ;;  %742 = vmatprep.subr.mxu0 %v398_v1  ;;  %v393_v3 = vld [vmem:[%s315_s11] sm:$0xff]  ;;  %v394_v6 = vld [vmem:[%s315_s11 + $0x8] sm:$0xff] }
  0x88   : > { %392 = vst.msk [vmem:[#allocation2 + $0x8] sm:$0xff] %vm390_vm0, %v1096_v0  ;;  %743 = vmatpush3.msra.mxu0 %v398_v1  ;;  %750 = vmatprep.mubr.msk.f32.mxu0 %vm390_vm0, %v393_v3  ;;  %v395_v5 = vld [vmem:[#allocation9] sm:$0xff]  ;;  %s726_s9 = sshll.u32 %s1080_s23, 4  ;;  %v723_v7 = vld [vmem:[%s1431_s4] ss:$0 sm:$0xff]  ;;  %v489_v16 = vld [vmem:[%s324_s17 + $0x8] sm:$0xff] }
  0x89   : > { %744 = vmatprep.subr.mxu0 %v397_v2  ;;  %s1347_s13 = sadd.s32 16, %s726_s9  ;;  %v491_v17 = vld [vmem:[%s333_s27 + $0x8] sm:$0xff]  ;;  %v488_v18 = vld [vmem:[%s324_s17] sm:$0xff]  ;;  %s373_s16 = scalar_lea.vmem [#allocation11], %s1338_s12 }
  0x8a   : > { %745 = vmatpush3.msra.mxu0 %v397_v2  ;;  %v490_v19 = vld [vmem:[%s333_s27] sm:$0xff]  ;;  %v493_v20 = vsub.f32 %v489_v16, %v491_v17  ;;  %p727_p10 = scmp.gt.s32.totalorder %s1347_s13, 16 }
  0x8b   : > { %746 = vmatprep.subr.mxu0 %v396_v4  ;;  %v492_v21 = vsub.f32 %v488_v18, %v490_v19 }
  0x8c   : > { %747 = vmatpush3.msra.mxu0 %v396_v4  ;;  %v495_v22 = vmul.f32 %v493_v20, %v493_v20 }
  0x8d   : > { %748 = vmatprep.subr.mxu0 %v395_v5  ;;  %v494_v23 = vmul.f32 %v492_v21, %v492_v21 }
  0x8e   : > { %749 = vmatpush3.msra.mxu0 %v395_v5 }
  0x8f   : > { %751 = vmatmul.mubr.msk.f32.vlgmr.msra.gmra.mxu0 %vm390_vm0, %v394_v6 }
 0x14f   : > { %v752_v8 = vpop.f32.mrf.mxu0 }
 0x150   : > { %v485_v9 = vadd.f32 %v752_v8, %v723_v7 }
 0x151   : > { %v479_v10 = vpop.f32.mrf.mxu0 }
 0x152   : > { %v497_v11 = vsub.f32 0.0, %v485_v9  ;;  %v480_v12 = vadd.f32 %v723_v7, %v479_v10 }
 0x154   : > { %v500_v13 = vmul.f32 1.442695, %v497_v11  ;;  %v496_v14 = vsub.f32 0.0, %v480_v12 }
 0x156   : > { %865 = vpow2.f32 %v500_v13  ;;  %v498_v15 = vmul.f32 1.442695, %v496_v14 }
 0x158   : > { %867 = vpow2.f32 %v498_v15 }
 0x163   : > { %v866_v24 = vpop.eup %865 }
 0x164   : > { %v503_v25 = vmul.f32 %v866_v24, %v495_v22  ;;  %512 = sbr.rel (%p727_p10) target bundleno = 365 (0x16d), region = 64 }
 0x165   : > { %v868_v26 = vpop.eup %867 }
 0x166   : > { %v505_v27 = vadd.f32 %v503_v25, %v485_v9  ;;  %v502_v28 = vmul.f32 %v868_v26, %v494_v23 }
 0x168   : > { %v504_v29 = vadd.f32 %v502_v28, %v480_v12 }
 0x169   : > { %v513_v30 = vld [vmem:[#allocation2] sm:$0xff]  ;;  %v514_v31 = vld [vmem:[#allocation2 + $0x8] sm:$0xff] }
 0x16a   : > { %v515_v32 = vadd.f32 %v513_v30, %v504_v29  ;;  %v516_v33 = vadd.f32 %v514_v31, %v505_v27 }
 0x16c   : > { %517 = vst.msk [vmem:[#allocation2] sm:$0xff] %vm390_vm0, %v515_v32  ;;  %518 = vst.msk [vmem:[#allocation2 + $0x8] sm:$0xff] %vm390_vm0, %v516_v33 }
 0x16d PF: > { %p728_p2 = scmp.le.s32.totalorder %s1347_s13, 16 }
 0x16f   : > { %522 = sbr.rel (%p728_p2) target bundleno = 385 (0x181), region = 68 }
 0x174   : > { %v523_v34 = vlaneseq  ;;  %v526_v35 = vstv %s726_s9  ;;  %v529_v39 = vld [vmem:[#allocation2] sm:$0xff]  ;;  %v530_v42 = vld [vmem:[#allocation2 + $0x8] sm:$0xff] }
 0x176   : > { %v524_v36 = vshrl.u32 %v523_v34, 7 }
 0x178   : > { %v527_v37 = vadd.s32 %v526_v35, %v524_v36  ;;  %v525_v38 = vadd.s32 8, %v524_v36 }
 0x17a   : > { %vm531_vm1 = vcmp.lt.s32.totalorder %v527_v37, 16  ;;  %v528_v40 = vadd.s32 %v526_v35, %v525_v38 }
 0x17b   : > { %v533_v41 = vsel %vm531_vm1, %v504_v29, 0.0 }
 0x17c   : > { %v535_v43 = vadd.f32 %v533_v41, %v529_v39  ;;  %vm532_vm2 = vcmp.lt.s32.totalorder %v528_v40, 16 }
 0x17d   : > { %v534_v44 = vsel %vm532_vm2, %v505_v27, 0.0 }
 0x17e   : > { %537 = vst.msk [vmem:[#allocation2] sm:$0xff] %vm390_vm0, %v535_v43  ;;  %v536_v45 = vadd.f32 %v534_v44, %v530_v42 }
 0x180   : > { %538 = vst.msk [vmem:[#allocation2 + $0x8] sm:$0xff] %vm390_vm0, %v536_v45 }
 0x181 PF: > { %s730_s1 = sshll.u32 %s1080_s23, 7  ;;  %s572_s10 = sshll.u32 %s373_s16, 4  ;;  %s573_s10 = int_to_ptr.vmem [resolvable:$true] %s572_s10 }
 0x182   : > { %s1377_s14 = scalar_lea.hbm %s1432_s5, %s730_s1  ;;  %s559_s30 = scalar_lea.sflag [#allocation5], %s371_s28 }
 0x183   : > { %s979_s11 = scalar_lea.vmem %s573_s10, 128  ;;  %p1459_p12 = scmp.ne.s32.totalorder %s1451_s7, 0 }
 0x184   : > { %p980_p4 = scmp.ne.s32.totalorder %s573_s10, %s979_s11  ;;  %s1097_s23 = smov [#allocation11]  }
 0x185   : > { %v542_v46 = vld [vmem:[#allocation2] sm:$0xff]  ;;  %s983_s29 = sshll.u32 %s1097_s23, 4  ;;  %s984_s29 = int_to_ptr.vmem [resolvable:$false] %s983_s29 }
 0x186   : > { %v544_v48 = vsel %vm390_vm0, %v542_v46, 0.0  ;;  %p981_p11 = pnand %p980_p4, %p1459_p12  ;;  %s985_s8 = scalar_lea.vmem %s984_s29, 256 }
 0x187   : > { %v543_v47 = vld [vmem:[#allocation2 + $0x8] sm:$0xff]  ;;  %p986_p0 = scmp.lt.s32.totalorder %s573_s10, %s984_s29  ;;  %p987_p1 = scmp.lt.s32.totalorder %s985_s8, %s979_s11 }
 0x188   : > { %v545_v49 = vsel %vm390_vm0, %v543_v47, 0.0  ;;  %p982_p13 = pneg %p981_p11 }
 0x189   : > { %v546_v50 = vadd.f32 %v545_v49, %v544_v48  ;;  %p988_p3 = por %p987_p1, %p986_p0 }
 0x18b   : > { %547 = vadd.xlane.f32.xlu0 %v546_v50  ;;  %p989_p6 = pnand %p988_p3, %p982_p13 }
 0x214   : > { %v548_v51 = vpop.xlane.xlu0 %547 }
 0x215   : > { %v549_v52 = vrot.slane %v548_v51, 4 }
 0x217   : > { %v550_v53 = vadd.f32 %v549_v52, %v548_v51 }
 0x219   : > { %v551_v54 = vrot.slane %v550_v53, 2 }
 0x21b   : > { %v552_v55 = vadd.f32 %v551_v54, %v550_v53 }
 0x21d   : > { %v553_v56 = vrot.slane %v552_v55, 1 }
 0x21f   : > { %v554_v57 = vadd.f32 %v553_v56, %v552_v55 }
 0x221   : > { %753 = vpush %v554_v57 }
 0x252   : > { %s754_s26 = spop %753 }
 0x253   : > { %v556_v58 = vstv %s754_s26 }
 0x254   : > { %557 = vst [vmem:[%s373_s16] sm:$0xff] %v556_v58 }
 0x255   : > { %992 = shalt.err (!%p989_p6)
}
 0x256   : > { %s993_s17 = scalar_lea.hbm %s1377_s14, 128  ;;  %s997_s12 = scalar_lea.hbm %s1432_s5, 256 }
 0x257   : > { %p994_p5 = scmp.ne.s32.totalorder %s1377_s14, %s993_s17  ;;  %p998_p8 = scmp.lt.s32.totalorder %s1377_s14, %s1432_s5 }
 0x258   : > { %p999_p10 = scmp.lt.s32.totalorder %s997_s12, %s993_s17 }
 0x259   : > { %p995_p9 = pnand %p994_p5, %p1459_p12 }
 0x25a   : > { %p1000_p2 = por %p999_p10, %p998_p8 }
 0x25b   : > { %p996_p7 = pneg %p995_p9 }
 0x25d   : > { %p1001_p4 = pnand %p1000_p2, %p996_p7 }
 0x25f   : > { %1004 = shalt.err (!%p1001_p4)
}
 0x260   : > { %765 = dma.vmem_to_hbm [thread:$0]  (%p1459_p12), %s573_s10, 128, %s1377_s14, %s559_s30  }
 0x261 PF: > { %s584_s15 = sand.u32 1, %s1060_s18   ;;  %p1460_p11 = scmp.ne.s32.totalorder %s1452_s21, 0 }
 0x262   : > { %p1461_p13 = scmp.ge.s32.totalorder %s1088_s25, 2  ;;  %s585_s6 = scalar_lea.sflag [#allocation5], %s584_s15 }
 0x264   : > { %p782_p0 = pnand %p1461_p13, %p1460_p11 }
 0x266   : > { %p783_p1 = pneg %p782_p0 }
 0x268   : > { %1054 = dma.done.wait (%p783_p1), %s585_s6, 128  }
 0x269   : > { %1056 = vsyncadd (%p783_p1), %s585_s6, 4294967168  ;;  %s25_s25 = sadd.s32 1, %s1088_s25   ;;  %s1462_s16 = sld [smem:[#allocation16_spill]] }
 0x26a   : > { %p22_p3 = scmp.ge.s32.totalorder %s25_s25, 4   ;;  %s1463_s20 = sld [smem:[#allocation19_spill]] }
 0x26b   : > { %s1464_s23 = sld [smem:[#allocation17_spill]]  ;;  %s1466_s18 = smov %s1064_s19 }
 0x26c   : > { %s1465_s24 = sld [smem:[#allocation18_spill]]  ;;  %s1468_s21 = smov %s1076_s22 }
 0x26d   : > { %s1417_s22 = smov 0   ;;  %24 = sbr.rel (!%p22_p3) target bundleno = 12 (0xc), region = 129 }
 0x26f   : > { %s1467_s19 = smov %s1462_s16 }
 0x272   :  { %590 = vsyncpa [#allocation4], 1 }
 0x273   :  { %592 = vsyncpa [#allocation4 + $0x1], 1 }
 0x274   :  { %593 = vsyncpa [#allocation7], 1 }
 0x275   :  { %595 = vsyncpa [#allocation7 + $0x1], 1 }
 0x276   :  { %596 = vsyncpa [#allocation10], 1 }
 0x277   :  { %597 = vsyncpa [#allocation5], 1 }
 0x278   :  { %599 = vsyncpa [#allocation5 + $0x1], 1 }

</bundles_post_ra>
